<compile_context>
chip_gen: v6e
topology: v6e:2x2x1
jax: 0.10.0
libtpu: 0.0.40
codegen_flags: <defaults>
</compile_context>

<pallas_src>
import functools

import jax
import jax.numpy as jnp
from jax import lax
from jax.experimental import pallas as pl
from jax.experimental.pallas import tpu as pltpu

# ---------------------------------------------------------------------------
# Model dimensions (synthetic, consistent with the module's __init__)
# ---------------------------------------------------------------------------
BATCH = 2
BATCH_PAD = 8                          # pad to f32 sublane tile
CHANNELS = 4
HEIGHT = 16
WIDTH = 16
D_IN = CHANNELS * HEIGHT * WIDTH       # flattened birdview obs = 1024
HIDDEN = 64                            # features_extractor.hidden_size
POLICY_ARCH = (256, 256)               # policy_head_arch
VALUE_ARCH = (256, 256)                # value_head_arch
ACTION_DIM = 2                         # action_space shape (2,)
HEAD_W = 8                             # packed head width: mu(2)|sigma(2)|v3(1)|pad(3)

# Bias pack layout (single (1, BIAS_LANES) f32 buffer, 128-lane aligned starts)
B_ENC_OFF = 0                          # width HIDDEN
B_P1_OFF = 128                         # width 256
B_P2_OFF = 384                         # width 256
B_HEADP_OFF = 640                      # width HEAD_W (mu bias 0:2, sigma bias 2:4)
B_HEADV_OFF = 768                      # width HEAD_W (v3 bias at col 4)
B_V1_OFF = 896                         # width 256
B_V2_OFF = 1152                        # width 256
BIAS_LANES = 1408

# Output slab layout (single (BATCH_PAD, OUT_LANES) f32 buffer)
OUT_FEAT_OFF = 0                       # features, width HIDDEN
OUT_HEADP_OFF = 128                    # policy head:  mu @ +0:2, sigma @ +2:4
OUT_HEADV_OFF = 256                    # value head:   value @ +4
OUT_LANES = 384

# Action space ranges (action_space.action_ranges) - synthetic: [-1, 1] per dim.
A_LOW = jnp.array([-1.0, -1.0], dtype=jnp.float32)
A_HIGH = jnp.array([1.0, 1.0], dtype=jnp.float32)
# Beta distribution support
D_LOW, D_HIGH = 0.0, 1.0


# ---------------------------------------------------------------------------
# Pallas kernel: all dense layers of the forward pass (single shot, no grid)
# ---------------------------------------------------------------------------
def _policy_kernel(
    obs_ref,                                   # (BATCH_PAD, D_IN)   f32
    wenc_ref,                                  # (D_IN, HIDDEN)      bf16
    wp1_ref, wp2_ref,                          # policy head         bf16
    wv1_ref, wv2_ref,                          # value head          bf16
    whead_ref,                                 # (256, HEAD_W)       bf16  mu|sigma|v3
    bias_ref,                                  # (1, BIAS_LANES)     f32
    out_ref,                                   # (BATCH_PAD, OUT_LANES) f32
):
    f32 = jnp.float32
    bf16 = jnp.bfloat16

    x = obs_ref[...].astype(bf16)
    w_head = whead_ref[...]                    # shared by policy & value heads

    # features = ReLU(obs @ W_enc + b_enc)   -- f32 accumulation on the MXU
    feat = jnp.maximum(
        jnp.dot(x, wenc_ref[...], preferred_element_type=f32)
        + bias_ref[:, B_ENC_OFF:B_ENC_OFF + HIDDEN],
        0.0,
    )
    feat_b = feat.astype(bf16)

    # ---- policy head: Linear+ReLU, Linear+ReLU, fused (mu|sigma) linear ----
    p = jnp.maximum(
        jnp.dot(feat_b, wp1_ref[...], preferred_element_type=f32)
        + bias_ref[:, B_P1_OFF:B_P1_OFF + POLICY_ARCH[0]],
        0.0,
    )
    p = jnp.maximum(
        jnp.dot(p.astype(bf16), wp2_ref[...], preferred_element_type=f32)
        + bias_ref[:, B_P2_OFF:B_P2_OFF + POLICY_ARCH[1]],
        0.0,
    )
    head_p = (
        jnp.dot(p.astype(bf16), w_head, preferred_element_type=f32)
        + bias_ref[:, B_HEADP_OFF:B_HEADP_OFF + HEAD_W]
    )                                          # cols 0:2 = mu, 2:4 = sigma

    # ---- value head: Linear+ReLU, Linear+ReLU, Linear(->1) ----
    v = jnp.maximum(
        jnp.dot(feat_b, wv1_ref[...], preferred_element_type=f32)
        + bias_ref[:, B_V1_OFF:B_V1_OFF + VALUE_ARCH[0]],
        0.0,
    )
    v = jnp.maximum(
        jnp.dot(v.astype(bf16), wv2_ref[...], preferred_element_type=f32)
        + bias_ref[:, B_V2_OFF:B_V2_OFF + VALUE_ARCH[1]],
        0.0,
    )
    head_v = (
        jnp.dot(v.astype(bf16), w_head, preferred_element_type=f32)
        + bias_ref[:, B_HEADV_OFF:B_HEADV_OFF + HEAD_W]
    )                                          # col 4 = value

    # Single packed output slab; every store starts at a 128-lane boundary.
    out_ref[:, OUT_FEAT_OFF:OUT_FEAT_OFF + HIDDEN] = feat
    out_ref[:, OUT_HEADP_OFF:OUT_HEADP_OFF + HEAD_W] = head_p
    out_ref[:, OUT_HEADV_OFF:OUT_HEADV_OFF + HEAD_W] = head_v


def _run_pallas(obs_pad, params):
    vmem = pl.BlockSpec(memory_space=pltpu.MemorySpace.VMEM)
    return pl.pallas_call(
        _policy_kernel,
        out_shape=jax.ShapeDtypeStruct((BATCH_PAD, OUT_LANES), jnp.float32),
        in_specs=[vmem] * (1 + len(params)),
        out_specs=vmem,
    )(obs_pad, *params)


# ---------------------------------------------------------------------------
# Parameter construction (deterministic orthogonal init, biases = 0,
# as in EasychauffeurPolicy.init_weights), packed for the kernel.
# ---------------------------------------------------------------------------
def _pack_biases(b_enc, b_p1, b_p2, b_mu, b_sg, b_v3, b_v1, b_v2):
    pack = jnp.zeros((1, BIAS_LANES), jnp.float32)
    pack = pack.at[0, B_ENC_OFF:B_ENC_OFF + HIDDEN].set(b_enc)
    pack = pack.at[0, B_P1_OFF:B_P1_OFF + POLICY_ARCH[0]].set(b_p1)
    pack = pack.at[0, B_P2_OFF:B_P2_OFF + POLICY_ARCH[1]].set(b_p2)
    pack = pack.at[0, B_HEADP_OFF:B_HEADP_OFF + ACTION_DIM].set(b_mu)
    pack = pack.at[0, B_HEADP_OFF + ACTION_DIM:B_HEADP_OFF + 2 * ACTION_DIM].set(b_sg)
    pack = pack.at[0, B_HEADV_OFF + 2 * ACTION_DIM:B_HEADV_OFF + 2 * ACTION_DIM + 1].set(b_v3)
    pack = pack.at[0, B_V1_OFF:B_V1_OFF + VALUE_ARCH[0]].set(b_v1)
    pack = pack.at[0, B_V2_OFF:B_V2_OFF + VALUE_ARCH[1]].set(b_v2)
    return pack


def _make_params(key):
    # TODO(synk): build_enc is external; modeled as a single Linear+ReLU extractor.
    ortho = jax.nn.initializers.orthogonal()
    keys = jax.random.split(key, 8)
    w_enc = ortho(keys[0], (D_IN, HIDDEN), jnp.float32)
    w_p1 = ortho(keys[1], (HIDDEN, POLICY_ARCH[0]), jnp.float32)
    w_p2 = ortho(keys[2], (POLICY_ARCH[0], POLICY_ARCH[1]), jnp.float32)
    w_mu = ortho(keys[3], (POLICY_ARCH[1], ACTION_DIM), jnp.float32)
    w_sg = ortho(keys[4], (POLICY_ARCH[1], ACTION_DIM), jnp.float32)
    w_v1 = ortho(keys[5], (HIDDEN, VALUE_ARCH[0]), jnp.float32)
    w_v2 = ortho(keys[6], (VALUE_ARCH[0], VALUE_ARCH[1]), jnp.float32)
    w_v3 = ortho(keys[7], (VALUE_ARCH[1], 1), jnp.float32)

    # Fused head weight: mu (cols 0:2) | sigma (cols 2:4) | v3 (col 4) | zero pad.
    w_head = jnp.zeros((POLICY_ARCH[1], HEAD_W), jnp.float32)
    w_head = w_head.at[:, 0:ACTION_DIM].set(w_mu)
    w_head = w_head.at[:, ACTION_DIM:2 * ACTION_DIM].set(w_sg)
    w_head = w_head.at[:, 2 * ACTION_DIM:2 * ACTION_DIM + 1].set(w_v3)

    # All biases zero, as in init_weights (bias.data.fill_(0.0)).
    zeros = lambda n: jnp.zeros((n,), jnp.float32)
    biases = _pack_biases(
        zeros(HIDDEN), zeros(POLICY_ARCH[0]), zeros(POLICY_ARCH[1]),
        zeros(ACTION_DIM), zeros(ACTION_DIM), zeros(1),
        zeros(VALUE_ARCH[0]), zeros(VALUE_ARCH[1]),
    )

    bf16 = jnp.bfloat16
    return (
        w_enc.astype(bf16),
        w_p1.astype(bf16),
        w_p2.astype(bf16),
        w_v1.astype(bf16),
        w_v2.astype(bf16),
        w_head.astype(bf16),
        biases,  # biases kept f32
    )


# ---------------------------------------------------------------------------
# Forward wrapper reproducing EasychauffeurPolicy.forward (deterministic=True)
# ---------------------------------------------------------------------------
@functools.partial(jax.jit, static_argnames=("clip_action",))
def easychauffeur_forward(obs, params, clip_action=False):
    """Returns (actions, values, log_prob, mu, sigma, features)."""
    b = obs.shape[0]
    obs_flat = obs.reshape(b, -1).astype(jnp.float32)           # NCHW -> (B, C*H*W)
    obs_pad = jnp.pad(obs_flat, ((0, BATCH_PAD - b), (0, 0)))   # pad batch to 8

    slab = _run_pallas(obs_pad, params)
    features = slab[:b, OUT_FEAT_OFF:OUT_FEAT_OFF + HIDDEN]
    mu = slab[:b, OUT_HEADP_OFF:OUT_HEADP_OFF + ACTION_DIM]
    sigma = slab[:b, OUT_HEADP_OFF + ACTION_DIM:OUT_HEADP_OFF + 2 * ACTION_DIM]
    values = slab[:b, OUT_HEADV_OFF + 2 * ACTION_DIM]           # (B,)

    # TODO(synk): BetaDistribution_waymo is external; assuming the standard
    # Beta parameterization alpha = 1 + softplus(mu), beta = 1 + softplus(sigma).
    alpha = 1.0 + jax.nn.softplus(mu)
    beta = 1.0 + jax.nn.softplus(sigma)

    # TODO(synk): stochastic Beta sampling not implemented; deterministic=True
    # path uses the distribution mean, as in SB3-style get_actions(deterministic=True).
    actions_beta = alpha / (alpha + beta)                       # in (0, 1) = [d_low, d_high]

    # Beta log-prob of the chosen actions (independent dims summed).
    x = jnp.clip(actions_beta, 1e-6, 1.0 - 1e-6)
    log_prob = (
        (alpha - 1.0) * jnp.log(x)
        + (beta - 1.0) * jnp.log1p(-x)
        + lax.lgamma(alpha + beta)
        - lax.lgamma(alpha)
        - lax.lgamma(beta)
    ).sum(axis=-1)

    # unscale_action: map from Beta support [0, 1] to the env action range.
    actions = (actions_beta - D_LOW) / (D_HIGH - D_LOW) * (A_HIGH - A_LOW) + A_LOW
    if clip_action:
        actions = jnp.clip(actions, A_LOW, A_HIGH)

    return actions, values, log_prob, mu, sigma, features


if __name__ == "__main__":
    key = jax.random.PRNGKey(0)
    k_obs, k_params = jax.random.split(key)

    obs = jax.random.normal(k_obs, (BATCH, CHANNELS, HEIGHT, WIDTH), dtype=jnp.float32)
    params = _make_params(k_params)

    actions, values, log_prob, mu, sigma, features = easychauffeur_forward(
        obs, params, clip_action=True
    )
    jax.block_until_ready((actions, values, log_prob, mu, sigma, features))

    assert actions.shape == (BATCH, ACTION_DIM)
    assert values.shape == (BATCH,)
    assert log_prob.shape == (BATCH,)
    assert mu.shape == (BATCH, ACTION_DIM)
    assert sigma.shape == (BATCH, ACTION_DIM)
    assert features.shape == (BATCH, HIDDEN)
    assert all(
        bool(jnp.all(jnp.isfinite(t)))
        for t in (actions, values, log_prob, mu, sigma, features)
    )

    print("KERNEL_OK")
</pallas_src>

<mosaic_0001>
module attributes {stable_mosaic.version = 11 : i64} {
  func.func @_policy_kernel(%arg0: memref<8x1024xf32, #tpu.memory_space<vmem>>, %arg1: memref<1024x64xbf16, #tpu.memory_space<vmem>>, %arg2: memref<64x256xbf16, #tpu.memory_space<vmem>>, %arg3: memref<256x256xbf16, #tpu.memory_space<vmem>>, %arg4: memref<64x256xbf16, #tpu.memory_space<vmem>>, %arg5: memref<256x256xbf16, #tpu.memory_space<vmem>>, %arg6: memref<256x8xbf16, #tpu.memory_space<vmem>>, %arg7: memref<1x1408xf32, #tpu.memory_space<vmem>>, %arg8: memref<8x384xf32, #tpu.memory_space<vmem>>) attributes {dimension_semantics = [], scalar_prefetch = 0 : i64, scratch_operands = 0 : i64, tpu.core_type = #tpu.core_type<tc>} {
    %c0 = arith.constant 0 : index
    %c0_0 = arith.constant 0 : index
    %0 = vector.load %arg0[%c0, %c0_0] : memref<8x1024xf32, #tpu.memory_space<vmem>>, vector<8x1024xf32>
    %1 = arith.truncf %0 : vector<8x1024xf32> to vector<8x1024xbf16>
    %c0_1 = arith.constant 0 : index
    %c0_2 = arith.constant 0 : index
    %2 = vector.load %arg6[%c0_1, %c0_2] : memref<256x8xbf16, #tpu.memory_space<vmem>>, vector<256x8xbf16>
    %c0_3 = arith.constant 0 : index
    %c0_4 = arith.constant 0 : index
    %3 = vector.load %arg1[%c0_3, %c0_4] : memref<1024x64xbf16, #tpu.memory_space<vmem>>, vector<1024x64xbf16>
    %cst = arith.constant dense<0.000000e+00> : vector<8x64xf32>
    %4 = tpu.matmul %1, %3, %cst {dimension_numbers = #tpu.dot_dimension_numbers<[1], [0], [0], [1], [0, 0, 1, 1], [], []>} : vector<8x1024xbf16>, vector<1024x64xbf16>, vector<8x64xf32> -> vector<8x64xf32>
    %c0_5 = arith.constant 0 : index
    %c0_6 = arith.constant 0 : index
    %5 = vector.load %arg7[%c0_5, %c0_6] : memref<1x1408xf32, #tpu.memory_space<vmem>>, vector<1x64xf32>
    %6 = vector.broadcast %5 : vector<1x64xf32> to vector<8x64xf32>
    %7 = arith.addf %4, %6 : vector<8x64xf32>
    %cst_7 = arith.constant 0.000000e+00 : f32
    %8 = vector.broadcast %cst_7 : f32 to vector<8x64xf32>
    %9 = arith.maximumf %7, %8 : vector<8x64xf32>
    %10 = arith.truncf %9 : vector<8x64xf32> to vector<8x64xbf16>
    %c0_8 = arith.constant 0 : index
    %c0_9 = arith.constant 0 : index
    %11 = vector.load %arg2[%c0_8, %c0_9] : memref<64x256xbf16, #tpu.memory_space<vmem>>, vector<64x256xbf16>
    %cst_10 = arith.constant dense<0.000000e+00> : vector<8x256xf32>
    %12 = tpu.matmul %10, %11, %cst_10 {dimension_numbers = #tpu.dot_dimension_numbers<[1], [0], [0], [1], [0, 0, 1, 1], [], []>} : vector<8x64xbf16>, vector<64x256xbf16>, vector<8x256xf32> -> vector<8x256xf32>
    %c0_11 = arith.constant 0 : index
    %c128 = arith.constant 128 : index
    %13 = vector.load %arg7[%c0_11, %c128] : memref<1x1408xf32, #tpu.memory_space<vmem>>, vector<1x256xf32>
    %14 = vector.broadcast %13 : vector<1x256xf32> to vector<8x256xf32>
    %15 = arith.addf %12, %14 : vector<8x256xf32>
    %cst_12 = arith.constant 0.000000e+00 : f32
    %16 = vector.broadcast %cst_12 : f32 to vector<8x256xf32>
    %17 = arith.maximumf %15, %16 : vector<8x256xf32>
    %18 = arith.truncf %17 : vector<8x256xf32> to vector<8x256xbf16>
    %c0_13 = arith.constant 0 : index
    %c0_14 = arith.constant 0 : index
    %19 = vector.load %arg3[%c0_13, %c0_14] : memref<256x256xbf16, #tpu.memory_space<vmem>>, vector<256x256xbf16>
    %cst_15 = arith.constant dense<0.000000e+00> : vector<8x256xf32>
    %20 = tpu.matmul %18, %19, %cst_15 {dimension_numbers = #tpu.dot_dimension_numbers<[1], [0], [0], [1], [0, 0, 1, 1], [], []>} : vector<8x256xbf16>, vector<256x256xbf16>, vector<8x256xf32> -> vector<8x256xf32>
    %c0_16 = arith.constant 0 : index
    %c384 = arith.constant 384 : index
    %21 = vector.load %arg7[%c0_16, %c384] : memref<1x1408xf32, #tpu.memory_space<vmem>>, vector<1x256xf32>
    %22 = vector.broadcast %21 : vector<1x256xf32> to vector<8x256xf32>
    %23 = arith.addf %20, %22 : vector<8x256xf32>
    %cst_17 = arith.constant 0.000000e+00 : f32
    %24 = vector.broadcast %cst_17 : f32 to vector<8x256xf32>
    %25 = arith.maximumf %23, %24 : vector<8x256xf32>
    %26 = arith.truncf %25 : vector<8x256xf32> to vector<8x256xbf16>
    %cst_18 = arith.constant dense<0.000000e+00> : vector<8x8xf32>
    %27 = tpu.matmul %26, %2, %cst_18 {dimension_numbers = #tpu.dot_dimension_numbers<[1], [0], [0], [1], [0, 0, 1, 1], [], []>} : vector<8x256xbf16>, vector<256x8xbf16>, vector<8x8xf32> -> vector<8x8xf32>
    %c0_19 = arith.constant 0 : index
    %c640 = arith.constant 640 : index
    %28 = vector.load %arg7[%c0_19, %c640] : memref<1x1408xf32, #tpu.memory_space<vmem>>, vector<1x8xf32>
    %29 = vector.broadcast %28 : vector<1x8xf32> to vector<8x8xf32>
    %30 = arith.addf %27, %29 : vector<8x8xf32>
    %c0_20 = arith.constant 0 : index
    %c0_21 = arith.constant 0 : index
    %31 = vector.load %arg4[%c0_20, %c0_21] : memref<64x256xbf16, #tpu.memory_space<vmem>>, vector<64x256xbf16>
    %cst_22 = arith.constant dense<0.000000e+00> : vector<8x256xf32>
    %32 = tpu.matmul %10, %31, %cst_22 {dimension_numbers = #tpu.dot_dimension_numbers<[1], [0], [0], [1], [0, 0, 1, 1], [], []>} : vector<8x64xbf16>, vector<64x256xbf16>, vector<8x256xf32> -> vector<8x256xf32>
    %c0_23 = arith.constant 0 : index
    %c896 = arith.constant 896 : index
    %33 = vector.load %arg7[%c0_23, %c896] : memref<1x1408xf32, #tpu.memory_space<vmem>>, vector<1x256xf32>
    %34 = vector.broadcast %33 : vector<1x256xf32> to vector<8x256xf32>
    %35 = arith.addf %32, %34 : vector<8x256xf32>
    %cst_24 = arith.constant 0.000000e+00 : f32
    %36 = vector.broadcast %cst_24 : f32 to vector<8x256xf32>
    %37 = arith.maximumf %35, %36 : vector<8x256xf32>
    %38 = arith.truncf %37 : vector<8x256xf32> to vector<8x256xbf16>
    %c0_25 = arith.constant 0 : index
    %c0_26 = arith.constant 0 : index
    %39 = vector.load %arg5[%c0_25, %c0_26] : memref<256x256xbf16, #tpu.memory_space<vmem>>, vector<256x256xbf16>
    %cst_27 = arith.constant dense<0.000000e+00> : vector<8x256xf32>
    %40 = tpu.matmul %38, %39, %cst_27 {dimension_numbers = #tpu.dot_dimension_numbers<[1], [0], [0], [1], [0, 0, 1, 1], [], []>} : vector<8x256xbf16>, vector<256x256xbf16>, vector<8x256xf32> -> vector<8x256xf32>
    %c0_28 = arith.constant 0 : index
    %c1152 = arith.constant 1152 : index
    %41 = vector.load %arg7[%c0_28, %c1152] : memref<1x1408xf32, #tpu.memory_space<vmem>>, vector<1x256xf32>
    %42 = vector.broadcast %41 : vector<1x256xf32> to vector<8x256xf32>
    %43 = arith.addf %40, %42 : vector<8x256xf32>
    %cst_29 = arith.constant 0.000000e+00 : f32
    %44 = vector.broadcast %cst_29 : f32 to vector<8x256xf32>
    %45 = arith.maximumf %43, %44 : vector<8x256xf32>
    %46 = arith.truncf %45 : vector<8x256xf32> to vector<8x256xbf16>
    %cst_30 = arith.constant dense<0.000000e+00> : vector<8x8xf32>
    %47 = tpu.matmul %46, %2, %cst_30 {dimension_numbers = #tpu.dot_dimension_numbers<[1], [0], [0], [1], [0, 0, 1, 1], [], []>} : vector<8x256xbf16>, vector<256x8xbf16>, vector<8x8xf32> -> vector<8x8xf32>
    %c0_31 = arith.constant 0 : index
    %c768 = arith.constant 768 : index
    %48 = vector.load %arg7[%c0_31, %c768] : memref<1x1408xf32, #tpu.memory_space<vmem>>, vector<1x8xf32>
    %49 = vector.broadcast %48 : vector<1x8xf32> to vector<8x8xf32>
    %50 = arith.addf %47, %49 : vector<8x8xf32>
    %c0_32 = arith.constant 0 : index
    %c0_33 = arith.constant 0 : index
    %51 = vector.load %arg8[%c0_32, %c0_33] : memref<8x384xf32, #tpu.memory_space<vmem>>, vector<8x64xf32>
    tpu.vector_store %arg8[%c0_32, %c0_33], %9 {strides = array<i32>} : memref<8x384xf32, #tpu.memory_space<vmem>>, vector<8x64xf32>,
    %c0_34 = arith.constant 0 : index
    %c128_35 = arith.constant 128 : index
    %52 = vector.load %arg8[%c0_34, %c128_35] : memref<8x384xf32, #tpu.memory_space<vmem>>, vector<8x8xf32>
    tpu.vector_store %arg8[%c0_34, %c128_35], %30 {strides = array<i32>} : memref<8x384xf32, #tpu.memory_space<vmem>>, vector<8x8xf32>,
    %c0_36 = arith.constant 0 : index
    %c256 = arith.constant 256 : index
    %53 = vector.load %arg8[%c0_36, %c256] : memref<8x384xf32, #tpu.memory_space<vmem>>, vector<8x8xf32>
    tpu.vector_store %arg8[%c0_36, %c256], %50 {strides = array<i32>} : memref<8x384xf32, #tpu.memory_space<vmem>>, vector<8x8xf32>,
    return
  }
}

</mosaic_0001>

<bundles_post_ra>
// kernel: easychauffeur_forward.1
= control target key start
LH: loop header
LB: loop body
LE: loop exit
PB: predicated region body
PF: predicated region fallthrough
CT: control target
= control target key end

     0   :  { %vm819_vm0 = vcmask 523264   ;;  %vm1662_vm1 = vcmask 64512   ;;  %s2770_s1 = inlined_call_operand.vmem [shape: bf16[1024,64], index: 1, kind: input, shape index: {}]   ;;  %s2771_s0 = inlined_call_operand.vmem [shape: f32[8,1024], index: 0, kind: input, shape index: {}]   ;;  %s2772_s2 = inlined_call_operand.vmem [shape: bf16[64,256], index: 2, kind: input, shape index: {}]   ;;  %s2773_s3 = inlined_call_operand.vmem [shape: bf16[256,256], index: 3, kind: input, shape index: {}]   ;;  %s2774_s7 = inlined_call_operand.vmem [shape: f32[1,1408], index: 7, kind: input, shape index: {}]   ;;  %s2775_s8 = inlined_call_operand.vmem [shape: f32[8,384], index: 8, kind: output, shape index: {}]   ;;  %s2776_s6 = inlined_call_operand.vmem [shape: bf16[256,8], index: 6, kind: input, shape index: {}]   ;;  %s2777_s4 = inlined_call_operand.vmem [shape: bf16[64,256], index: 4, kind: input, shape index: {}]   ;;  %s2778_s5 = inlined_call_operand.vmem [shape: bf16[256,256], index: 5, kind: input, shape index: {}]  }
   0x1   :  { %v1967_v0 = vld [vmem:[%s2770_s1 + $0x78] sm:$0xff]   ;;  %v1971_v4 = vld [vmem:[%s2770_s1 + $0x70] sm:$0xff]   ;;  %v1975_v8 = vld [vmem:[%s2770_s1 + $0x68] sm:$0xff]  }
   0x2   :  { %v1968_v1 = vld [vmem:[%s2770_s1 + $0xf8] sm:$0xff]   ;;  %1834 = vmatprep.subr.bf16.mxu0 %v1967_v0  ;;  %v1972_v5 = vld [vmem:[%s2770_s1 + $0xf0] sm:$0xff]   ;;  %v1976_v9 = vld [vmem:[%s2770_s1 + $0xe8] sm:$0xff]  }
   0x3   :  { %v1969_v2 = vld [vmem:[%s2770_s1 + $0x38] sm:$0xff]   ;;  %1856 = vmatprep.subr.bf16.mxu1 %v1968_v1  ;;  %v1973_v6 = vld [vmem:[%s2770_s1 + $0x30] sm:$0xff]   ;;  %v1977_v10 = vld [vmem:[%s2770_s1 + $0x28] sm:$0xff]  }
   0x4   :  { %v1970_v3 = vld [vmem:[%s2770_s1 + $0xb8] sm:$0xff]   ;;  %1835 = vmatpush3.bf16.msra.mxu0 %v1969_v2  ;;  %v1974_v7 = vld [vmem:[%s2770_s1 + $0xb0] sm:$0xff]   ;;  %v1978_v11 = vld [vmem:[%s2770_s1 + $0xa8] sm:$0xff]  }
   0x5   :  { %1857 = vmatpush3.bf16.msra.mxu1 %v1970_v3  ;;  %1836 = vmatprep.subr.bf16.mxu0 %v1971_v4  ;;  %v1979_v12 = vld [vmem:[%s2770_s1 + $0x60] sm:$0xff]   ;;  %v1983_v16 = vld [vmem:[%s2770_s1 + $0x58] sm:$0xff]   ;;  %v1987_v20 = vld [vmem:[%s2770_s1 + $0x50] sm:$0xff]  }
   0x6   :  { %1858 = vmatprep.subr.bf16.mxu1 %v1972_v5  ;;  %v1980_v13 = vld [vmem:[%s2770_s1 + $0xe0] sm:$0xff]   ;;  %v1984_v17 = vld [vmem:[%s2770_s1 + $0xd8] sm:$0xff]   ;;  %v1988_v21 = vld [vmem:[%s2770_s1 + $0xd0] sm:$0xff]  }
   0x7   :  { %v1981_v14 = vld [vmem:[%s2770_s1 + $0x20] sm:$0xff]   ;;  %v1985_v18 = vld [vmem:[%s2770_s1 + $0x18] sm:$0xff]   ;;  %v1989_v22 = vld [vmem:[%s2770_s1 + $0x10] sm:$0xff]  }
   0x8   :  { %1837 = vmatpush3.bf16.msra.mxu0 %v1973_v6  ;;  %v1982_v15 = vld [vmem:[%s2770_s1 + $0xa0] sm:$0xff]   ;;  %v1986_v19 = vld [vmem:[%s2770_s1 + $0x98] sm:$0xff]   ;;  %v1990_v23 = vld [vmem:[%s2770_s1 + $0x90] sm:$0xff]  }
   0x9   :  { %1859 = vmatpush3.bf16.msra.mxu1 %v1974_v7  ;;  %1838 = vmatprep.subr.bf16.mxu0 %v1975_v8  ;;  %v1991_v24 = vld [vmem:[%s2770_s1 + $0x48] sm:$0xff]   ;;  %v1995_v28 = vld [vmem:[%s2770_s1 + $0x40] sm:$0xff]   ;;  %v33_v33 = vld [vmem:[%s2771_s0 + $0x18] sm:$0xff] }
   0xa   :  { %1860 = vmatprep.subr.bf16.mxu1 %v1976_v9  ;;  %v1992_v25 = vld [vmem:[%s2770_s1 + $0xc8] sm:$0xff]   ;;  %v1996_v29 = vld [vmem:[%s2770_s1 + $0xc0] sm:$0xff]   ;;  %v41_v36 = vpack.c.bf16 %v33_v33, %v33_v33  ;;  %v32_v38 = vld [vmem:[%s2771_s0 + $0x10] sm:$0xff] }
   0xb   :  { %v1993_v26 = vld [vmem:[%s2770_s1 + $0x8] sm:$0xff]   ;;  %v1997_v30 = vld [vmem:[%s2770_s1] sm:$0xff]   ;;  %v40_v39 = vpack.c.bf16 %v32_v38, %v32_v38  ;;  %v1999_v40 = vld [vmem:[%s2770_s1 + $0x178] sm:$0xff]  }
   0xc   :  { %1839 = vmatpush3.bf16.msra.mxu0 %v1977_v10  ;;  %v1994_v27 = vld [vmem:[%s2770_s1 + $0x88] sm:$0xff]   ;;  %v1998_v31 = vld [vmem:[%s2770_s1 + $0x80] sm:$0xff]   ;;  %669 = vmatprep.mubr.bf16.mxu1 %v41_v36  ;;  %v2000_v41 = vld [vmem:[%s2770_s1 + $0x1f8] sm:$0xff]  }
   0xd   :  { %1861 = vmatpush3.bf16.msra.mxu1 %v1978_v11  ;;  %1840 = vmatprep.subr.bf16.mxu0 %v1979_v12  ;;  %v31_v32 = vld [vmem:[%s2771_s0 + $0x8] sm:$0xff]  ;;  %v30_v34 = vld [vmem:[%s2771_s0] sm:$0xff]  ;;  %v2001_v42 = vld [vmem:[%s2770_s1 + $0x138] sm:$0xff]  }
   0xe   :  { %1862 = vmatprep.subr.bf16.mxu1 %v1980_v13  ;;  %v39_v35 = vpack.c.bf16 %v31_v32, %v31_v32  ;;  %v38_v37 = vpack.c.bf16 %v30_v34, %v30_v34  ;;  %v2002_v43 = vld [vmem:[%s2770_s1 + $0x1b8] sm:$0xff]   ;;  %v2003_v44 = vld [vmem:[%s2770_s1 + $0x170] sm:$0xff]   ;;  %v2007_v48 = vld [vmem:[%s2770_s1 + $0x168] sm:$0xff]  }
   0xf   :  { %v2004_v45 = vld [vmem:[%s2770_s1 + $0x1f0] sm:$0xff]   ;;  %v2008_v49 = vld [vmem:[%s2770_s1 + $0x1e8] sm:$0xff]   ;;  %v2011_v52 = vld [vmem:[%s2770_s1 + $0x160] sm:$0xff]  }
  0x10   :  { %1841 = vmatpush3.bf16.msra.mxu0 %v1981_v14  ;;  %629 = vmatprep.mubr.bf16.mxu0 %v39_v35  ;;  %v2005_v46 = vld [vmem:[%s2770_s1 + $0x130] sm:$0xff]   ;;  %v2009_v50 = vld [vmem:[%s2770_s1 + $0x128] sm:$0xff]   ;;  %v2012_v53 = vld [vmem:[%s2770_s1 + $0x1e0] sm:$0xff]  }
  0x11   :  { %1863 = vmatpush3.bf16.msra.mxu1 %v1982_v15  ;;  %1842 = vmatprep.subr.bf16.mxu0 %v1983_v16  ;;  %v2006_v47 = vld [vmem:[%s2770_s1 + $0x1b0] sm:$0xff]   ;;  %v2010_v51 = vld [vmem:[%s2770_s1 + $0x1a8] sm:$0xff]   ;;  %v2013_v54 = vld [vmem:[%s2770_s1 + $0x120] sm:$0xff]  }
  0x12   :  { %1864 = vmatprep.subr.bf16.mxu1 %v1984_v17  ;;  %v2014_v55 = vld [vmem:[%s2770_s1 + $0x1a0] sm:$0xff]   ;;  %v2015_v56 = vld [vmem:[%s2770_s1 + $0x158] sm:$0xff]   ;;  %v2019_v60 = vld [vmem:[%s2770_s1 + $0x150] sm:$0xff]  }
  0x13   :  { %v2016_v57 = vld [vmem:[%s2770_s1 + $0x1d8] sm:$0xff]   ;;  %v2020_v61 = vld [vmem:[%s2770_s1 + $0x1d0] sm:$0xff]   ;;  %v2023_v0 = vld [vmem:[%s2770_s1 + $0x148] sm:$0xff]  }
  0x14   :  { %1843 = vmatpush3.bf16.msra.mxu0 %v1985_v18  ;;  %v2017_v58 = vld [vmem:[%s2770_s1 + $0x118] sm:$0xff]   ;;  %v2021_v62 = vld [vmem:[%s2770_s1 + $0x110] sm:$0xff]   ;;  %v2024_v1 = vld [vmem:[%s2770_s1 + $0x1c8] sm:$0xff]  }
  0x15   :  { %1865 = vmatpush3.bf16.msra.mxu1 %v1986_v19  ;;  %1844 = vmatprep.subr.bf16.mxu0 %v1987_v20  ;;  %v2018_v59 = vld [vmem:[%s2770_s1 + $0x198] sm:$0xff]   ;;  %v2022_v63 = vld [vmem:[%s2770_s1 + $0x190] sm:$0xff]   ;;  %v2025_v2 = vld [vmem:[%s2770_s1 + $0x108] sm:$0xff]  }
  0x16   :  { %1866 = vmatprep.subr.bf16.mxu1 %v1988_v21  ;;  %v2026_v3 = vld [vmem:[%s2770_s1 + $0x188] sm:$0xff]   ;;  %v2027_v4 = vld [vmem:[%s2770_s1 + $0x140] sm:$0xff]   ;;  %v37_v9 = vld [vmem:[%s2771_s0 + $0x38] sm:$0xff] }
  0x17   :  { %v2028_v5 = vld [vmem:[%s2770_s1 + $0x1c0] sm:$0xff]   ;;  %v35_v8 = vld [vmem:[%s2771_s0 + $0x28] sm:$0xff]  ;;  %v45_v11 = vpack.c.bf16 %v37_v9, %v37_v9  ;;  %v36_v13 = vld [vmem:[%s2771_s0 + $0x30] sm:$0xff] }
  0x18   :  { %1845 = vmatpush3.bf16.msra.mxu0 %v1989_v22  ;;  %v2029_v6 = vld [vmem:[%s2770_s1 + $0x100] sm:$0xff]   ;;  %v43_v10 = vpack.c.bf16 %v35_v8, %v35_v8  ;;  %v44_v15 = vpack.c.bf16 %v36_v13, %v36_v13  ;;  %v2031_v16 = vld [vmem:[%s2772_s2 + $0x30] ss:$8 sps:$4 sm:$0xff]   ;;  %v2033_v17 = vld [vmem:[%s2772_s2 + $0x34] ss:$8 sps:$4 sm:$0xff]  }
  0x19   :  { %1867 = vmatpush3.bf16.msra.mxu1 %v1990_v23  ;;  %1846 = vmatprep.subr.bf16.mxu0 %v1991_v24  ;;  %v2030_v7 = vld [vmem:[%s2770_s1 + $0x180] sm:$0xff]   ;;  %v2039_v20 = vld [vmem:[%s2772_s2 + $0x14] ss:$8 sps:$4 sm:$0xff]   ;;  %v2037_v21 = vld [vmem:[%s2772_s2 + $0x10] ss:$8 sps:$4 sm:$0xff]   ;;  %v2167_v24 = vmov 0  }
  0x1a   :  { %1868 = vmatprep.subr.bf16.mxu1 %v1992_v25  ;;  %v34_v12 = vld [vmem:[%s2771_s0 + $0x20] sm:$0xff]  ;;  %v2045_v25 = vld [vmem:[%s2773_s3 + $0x74] ss:$8 sps:$4 sm:$0xff]   ;;  %v2073_v9 = vld [vmem:[%s2773_s3 + $0xd0] ss:$8 sps:$4 sm:$0xff]  }
  0x1b   :  { %v42_v14 = vpack.c.bf16 %v34_v12, %v34_v12  ;;  %v2036_v18 = vld [vmem:[%s2772_s2 + $0x24] ss:$8 sps:$4 sm:$0xff]   ;;  %v2034_v19 = vld [vmem:[%s2772_s2 + $0x20] ss:$8 sps:$4 sm:$0xff]   ;;  %v2075_v8 = vld [vmem:[%s2773_s3 + $0xd4] ss:$8 sps:$4 sm:$0xff]  }
  0x1c   :  { %1847 = vmatpush3.bf16.msra.mxu0 %v1993_v26  ;;  %v2042_v22 = vld [vmem:[%s2772_s2 + $0x4] ss:$8 sps:$4 sm:$0xff]   ;;  %v2040_v23 = vld [vmem:[%s2772_s2] ss:$8 sps:$4 sm:$0xff]   ;;  %v2081_v12 = vld [vmem:[%s2773_s3 + $0xb4] ss:$8 sps:$4 sm:$0xff]  }
  0x1d   :  { %1869 = vmatpush3.bf16.msra.mxu1 %v1994_v27  ;;  %1848 = vmatprep.subr.bf16.mxu0 %v1995_v28  ;;  %v1669_v35 = vld [vmem:[%s2774_s7] ss:$0 sm:$0xff]  ;;  %v2079_v13 = vld [vmem:[%s2773_s3 + $0xb0] ss:$8 sps:$4 sm:$0xff]  }
  0x1e   :  { %1870 = vmatprep.subr.bf16.mxu1 %v1996_v29 }
  0x20   :  { %1849 = vmatpush3.bf16.msra.mxu0 %v1997_v30 }
  0x21   :  { %1871 = vmatpush3.bf16.msra.mxu1 %v1998_v31  ;;  %1878 = vmatprep.subr.bf16.mxu0 %v1999_v40 }
  0x22   :  { %1900 = vmatprep.subr.bf16.mxu1 %v2000_v41 }
  0x23   :  { %630 = vmatmul.mubr.bf16.vlgmr.msra.gmra.mxu0 %v38_v37 }
  0x24   :  { %670 = vmatmul.mubr.bf16.vlgmr.msra.gmra.mxu1 %v40_v39  ;;  %1879 = vmatpush3.bf16.msra.mxu0 %v2001_v42 }
  0x25   :  { %1901 = vmatpush3.bf16.msra.mxu1 %v2002_v43  ;;  %1880 = vmatprep.subr.bf16.mxu0 %v2003_v44 }
  0x26   :  { %1902 = vmatprep.subr.bf16.mxu1 %v2004_v45  ;;  %709 = vmatprep.mubr.bf16.mxu0 %v43_v10  ;;  %v2078_v10 = vld [vmem:[%s2773_s3 + $0xc4] ss:$8 sps:$4 sm:$0xff]  }
  0x27   :  { %749 = vmatprep.mubr.bf16.mxu1 %v45_v11  ;;  %v2076_v11 = vld [vmem:[%s2773_s3 + $0xc0] ss:$8 sps:$4 sm:$0xff]  }
  0x28   :  { %1881 = vmatpush3.bf16.msra.mxu0 %v2005_v46 }
  0x29   :  { %1903 = vmatpush3.bf16.msra.mxu1 %v2006_v47  ;;  %1882 = vmatprep.subr.bf16.mxu0 %v2007_v48 }
  0x2a   :  { %1904 = vmatprep.subr.bf16.mxu1 %v2008_v49 }
  0x2c   :  { %1883 = vmatpush3.bf16.msra.mxu0 %v2009_v50 }
  0x2d   :  { %1905 = vmatpush3.bf16.msra.mxu1 %v2010_v51  ;;  %1884 = vmatprep.subr.bf16.mxu0 %v2011_v52  ;;  %v2043_v52 = vld [vmem:[%s2773_s3 + $0x70] ss:$8 sps:$4 sm:$0xff]  }
  0x2e   :  { %1906 = vmatprep.subr.bf16.mxu1 %v2012_v53 }
  0x30   :  { %1885 = vmatpush3.bf16.msra.mxu0 %v2013_v54  ;;  %v2048_v54 = vld [vmem:[%s2773_s3 + $0x64] ss:$8 sps:$4 sm:$0xff]  }
  0x31   :  { %1907 = vmatpush3.bf16.msra.mxu1 %v2014_v55  ;;  %1886 = vmatprep.subr.bf16.mxu0 %v2015_v56  ;;  %v2046_v55 = vld [vmem:[%s2773_s3 + $0x60] ss:$8 sps:$4 sm:$0xff]   ;;  %v2051_v56 = vld [vmem:[%s2773_s3 + $0x54] ss:$8 sps:$4 sm:$0xff]  }
  0x32   :  { %1908 = vmatprep.subr.bf16.mxu1 %v2016_v57  ;;  %v2049_v57 = vld [vmem:[%s2773_s3 + $0x50] ss:$8 sps:$4 sm:$0xff]  }
  0x34   :  { %1887 = vmatpush3.bf16.msra.mxu0 %v2017_v58  ;;  %v2054_v58 = vld [vmem:[%s2773_s3 + $0x44] ss:$8 sps:$4 sm:$0xff]  }
  0x35   :  { %1909 = vmatpush3.bf16.msra.mxu1 %v2018_v59  ;;  %1888 = vmatprep.subr.bf16.mxu0 %v2019_v60  ;;  %v2052_v59 = vld [vmem:[%s2773_s3 + $0x40] ss:$8 sps:$4 sm:$0xff]   ;;  %v2057_v60 = vld [vmem:[%s2773_s3 + $0x34] ss:$8 sps:$4 sm:$0xff]  }
  0x36   :  { %1910 = vmatprep.subr.bf16.mxu1 %v2020_v61  ;;  %v2055_v61 = vld [vmem:[%s2773_s3 + $0x30] ss:$8 sps:$4 sm:$0xff]  }
  0x38   :  { %1889 = vmatpush3.bf16.msra.mxu0 %v2021_v62  ;;  %v2060_v62 = vld [vmem:[%s2773_s3 + $0x24] ss:$8 sps:$4 sm:$0xff]  }
  0x39   :  { %1911 = vmatpush3.bf16.msra.mxu1 %v2022_v63  ;;  %1890 = vmatprep.subr.bf16.mxu0 %v2023_v0  ;;  %v2058_v63 = vld [vmem:[%s2773_s3 + $0x20] ss:$8 sps:$4 sm:$0xff]   ;;  %v2063_v0 = vld [vmem:[%s2773_s3 + $0x14] ss:$8 sps:$4 sm:$0xff]  }
  0x3a   :  { %1912 = vmatprep.subr.bf16.mxu1 %v2024_v1  ;;  %v2061_v1 = vld [vmem:[%s2773_s3 + $0x10] ss:$8 sps:$4 sm:$0xff]  }
  0x3c   :  { %1891 = vmatpush3.bf16.msra.mxu0 %v2025_v2  ;;  %v2066_v2 = vld [vmem:[%s2773_s3 + $0x4] ss:$8 sps:$4 sm:$0xff]  }
  0x3d   :  { %1913 = vmatpush3.bf16.msra.mxu1 %v2026_v3  ;;  %1892 = vmatprep.subr.bf16.mxu0 %v2027_v4  ;;  %v2064_v3 = vld [vmem:[%s2773_s3] ss:$8 sps:$4 sm:$0xff]   ;;  %v2069_v4 = vld [vmem:[%s2773_s3 + $0xf4] ss:$8 sps:$4 sm:$0xff]  }
  0x3e   :  { %1914 = vmatprep.subr.bf16.mxu1 %v2028_v5  ;;  %v2067_v5 = vld [vmem:[%s2773_s3 + $0xf0] ss:$8 sps:$4 sm:$0xff]  }
  0x40   :  { %1893 = vmatpush3.bf16.msra.mxu0 %v2029_v6  ;;  %v2072_v6 = vld [vmem:[%s2773_s3 + $0xe4] ss:$8 sps:$4 sm:$0xff]  }
  0x41   :  { %1915 = vmatpush3.bf16.msra.mxu1 %v2030_v7  ;;  %v2070_v7 = vld [vmem:[%s2773_s3 + $0xe0] ss:$8 sps:$4 sm:$0xff]  }
  0x42   :  { %831 = vmatprep.subr.bf16.mxu1 %v2033_v17  ;;  %v2085_v17 = vld [vmem:[%s2773_s3 + $0x90] ss:$8 sps:$4 sm:$0xff]  }
  0x43   :  { %710 = vmatmul.mubr.bf16.vlgmr.msra.gmra.mxu0 %v42_v14  ;;  %v2084_v14 = vld [vmem:[%s2773_s3 + $0xa4] ss:$8 sps:$4 sm:$0xff]  }
  0x44   :  { %750 = vmatmul.mubr.bf16.vlgmr.msra.gmra.mxu1 %v44_v15  ;;  %v2082_v15 = vld [vmem:[%s2773_s3 + $0xa0] ss:$8 sps:$4 sm:$0xff]  }
  0x45   :  { %832 = vmatpush1.bf16.msra.mxu1 %v2031_v16  ;;  %855 = vmatprep.mubr.bf16.mxu1 %v2167_v24  ;;  %v2087_v16 = vld [vmem:[%s2773_s3 + $0x94] ss:$8 sps:$4 sm:$0xff]  }
  0x46   :  { %833 = vmatprep.subr.bf16.mxu1 %v2036_v18  ;;  %v2090_v18 = vld [vmem:[%s2773_s3 + $0x84] ss:$8 sps:$4 sm:$0xff]  }
  0x49   :  { %834 = vmatpush1.bf16.msra.mxu1 %v2034_v19  ;;  %v2088_v19 = vld [vmem:[%s2773_s3 + $0x80] ss:$8 sps:$4 sm:$0xff]  }
  0x4a   :  { %835 = vmatprep.subr.bf16.mxu1 %v2039_v20  ;;  %v2091_v20 = vld [vmem:[%s2776_s6 + $0x78] sm:$0xff]  }
  0x4b   :  { %1922 = vmatprep.subr.bf16.mxu0 %v2091_v20 }
  0x4d   :  { %836 = vmatpush1.bf16.msra.mxu1 %v2037_v21  ;;  %v2092_v21 = vld [vmem:[%s2776_s6 + $0x38] sm:$0xff]  }
  0x4e   :  { %837 = vmatprep.subr.bf16.mxu1 %v2042_v22  ;;  %v2093_v22 = vld [vmem:[%s2776_s6 + $0x70] sm:$0xff]   ;;  %1923 = vmatpush3.bf16.msra.mxu0 %v2092_v21 }
  0x4f   :  { %1924 = vmatprep.subr.bf16.mxu0 %v2093_v22 }
  0x51   :  { %838 = vmatpush1.bf16.msra.mxu1 %v2040_v23  ;;  %v2094_v23 = vld [vmem:[%s2776_s6 + $0x30] sm:$0xff]  }
  0x52   :  { %1072 = vmatprep.subr.bf16.mxu1 %v2045_v25  ;;  %v2095_v25 = vld [vmem:[%s2776_s6 + $0x68] sm:$0xff]   ;;  %1925 = vmatpush3.bf16.msra.mxu0 %v2094_v23 }
  0x53   :  { %1926 = vmatprep.subr.bf16.mxu0 %v2095_v25 }
  0xe3   :  { %v1850_v26 = vpop.f32.mrf.mxu0 }
  0xe4   :  { %v1872_v27 = vpop.f32.mrf.mxu1 }
  0xe5   :  { %v1851_v28 = vpop.f32.mrf.mxu0 }
  0xe6   :  { %v1873_v29 = vpop.f32.mrf.mxu1  ;;  %v1852_v34 = vadd.f32 %v1851_v28, %v1850_v26  ;;  %v2096_v26 = vld [vmem:[%s2776_s6 + $0x28] sm:$0xff]   ;;  %v2098_v28 = vld [vmem:[%s2776_s6 + $0x20] sm:$0xff]  }
  0xe7   :  { %v1853_v30 = vpop.f32.mrf.mxu0  ;;  %v1874_v37 = vadd.f32 %v1873_v29, %v1872_v27  ;;  %v2097_v27 = vld [vmem:[%s2776_s6 + $0x60] sm:$0xff]   ;;  %1927 = vmatpush3.bf16.msra.mxu0 %v2096_v26  ;;  %v2099_v29 = vld [vmem:[%s2776_s6 + $0x58] sm:$0xff]  }
  0xe8   :  { %v1875_v31 = vpop.f32.mrf.mxu1  ;;  %v632_v36 = vadd.f32 %v1852_v34, %v1669_v35  ;;  %1928 = vmatprep.subr.bf16.mxu0 %v2097_v27  ;;  %v2100_v30 = vld [vmem:[%s2776_s6 + $0x18] sm:$0xff]  }
  0xe9   :  { %v1854_v32 = vpop.f32.mrf.mxu0  ;;  %v2101_v31 = vld [vmem:[%s2776_s6 + $0x50] sm:$0xff]  }
  0xea   :  { %v1876_v33 = vpop.f32.mrf.mxu1  ;;  %v672_v41 = vadd.f32 %v1874_v37, %v632_v36  ;;  %v2102_v32 = vld [vmem:[%s2776_s6 + $0x10] sm:$0xff]   ;;  %v767_v36 = vld [vmem:[%s2774_s7 + $0x1] sm:$0x3] }
  0xeb   :  { %1929 = vmatpush3.bf16.msra.mxu0 %v2098_v28  ;;  %v769_v33 = vlaneseq }
  0xec   :  { %1930 = vmatprep.subr.bf16.mxu0 %v2099_v29 }
  0xed   :  { %v770_v34 = vshrl.u32 %v769_v33, 7  ;;  %v2154_v33 = vld [vmem:[%s2778_s5 + $0xc4] ss:$8 sps:$4 sm:$0xff]  }
  0xef   :  { %1931 = vmatpush3.bf16.msra.mxu0 %v2100_v30  ;;  %v2597_v35 = vsub.s32 0, %v770_v34  ;;  %v2602_v37 = vsub.s32 1, %v770_v34  ;;  %v2152_v34 = vld [vmem:[%s2778_s5 + $0xc0] ss:$8 sps:$4 sm:$0xff]  }
  0xf0   :  { %1932 = vmatprep.subr.bf16.mxu0 %v2101_v31 }
  0xf3   :  { %1933 = vmatpush3.bf16.msra.mxu0 %v2102_v32 }
 0x103   :  { %v1894_v38 = vpop.f32.mrf.mxu0 }
 0x104   :  { %v1916_v39 = vpop.f32.mrf.mxu1 }
 0x105   :  { %v1895_v40 = vpop.f32.mrf.mxu0 }
 0x106   :  { %v1896_v42 = vadd.f32 %v1895_v40, %v1894_v38  ;;  %v1917_v43 = vpop.f32.mrf.mxu1  ;;  %v772_v38 = vrot.slane %v767_v36, %v2597_v35 }
 0x107   :  { %v1897_v44 = vpop.f32.mrf.mxu0  ;;  %v1918_v46 = vadd.f32 %v1917_v43, %v1916_v39  ;;  %v776_v39 = vrot.slane %v767_v36, %v2602_v37  ;;  %v2155_v36 = vld [vmem:[%s2778_s5 + $0xb0] ss:$8 sps:$4 sm:$0xff]  }
 0x108   :  { %v712_v45 = vadd.f32 %v1896_v42, %v672_v41  ;;  %v1919_v47 = vpop.f32.mrf.mxu1 }
 0x109   :  { %v1898_v48 = vpop.f32.mrf.mxu0 }
 0x10a   :  { %v752_v49 = vadd.f32 %v1918_v46, %v712_v45  ;;  %v1920_v50 = vpop.f32.mrf.mxu1 }
 0x10b   :  { %v2103_v50 = vld [vmem:[%s2776_s6 + $0x48] sm:$0xff]  }
 0x10c   :  { %v757_v51 = vmax.f32 %v752_v49, 0.0  ;;  %1934 = vmatprep.subr.bf16.mxu0 %v2103_v50 }
 0x10e   :  { %v2463_v53 = vpack.c.bf16 %v757_v51, %v757_v51  ;;  %1661 = vst.msk [vmem:[%s2775_s8] sm:$0xff] %vm819_vm0, %v757_v51  ;;  %v2104_v51 = vld [vmem:[%s2776_s6 + $0x8] sm:$0xff]  }
 0x10f   :  { %1935 = vmatpush3.bf16.msra.mxu0 %v2104_v51 }
 0x110   :  { %1742 = vmatmul.mubr.msk.bf16.vlgmr.msra.gmra.mxu1 %vm819_vm0, %v2463_v53 }
 0x111   :  { %1073 = vmatpush1.bf16.msra.mxu1 %v2043_v52  ;;  %v2105_v52 = vld [vmem:[%s2776_s6 + $0x40] sm:$0xff]  }
 0x112   :  { %1074 = vmatprep.subr.bf16.mxu1 %v2048_v54  ;;  %v2106_v54 = vld [vmem:[%s2776_s6] sm:$0xff]   ;;  %1936 = vmatprep.subr.bf16.mxu0 %v2105_v52 }
 0x113   :  { %1937 = vmatpush3.bf16.msra.mxu0 %v2106_v54 }
 0x115   :  { %1075 = vmatpush1.bf16.msra.mxu1 %v2046_v55  ;;  %v2109_v55 = vld [vmem:[%s2777_s4 + $0x34] ss:$8 sps:$4 sm:$0xff]  }
 0x116   :  { %1076 = vmatprep.subr.bf16.mxu1 %v2051_v56  ;;  %1328 = vmatprep.subr.bf16.mxu0 %v2109_v55  ;;  %v900_v56 = vld [vmem:[%s2774_s7 + $0x3] sm:$0x3] }
 0x119   :  { %1077 = vmatpush1.bf16.msra.mxu1 %v2049_v57  ;;  %v905_v57 = vrot.slane %v900_v56, %v2597_v35 }
 0x11a   :  { %1078 = vmatprep.subr.bf16.mxu1 %v2054_v58  ;;  %v909_v58 = vrot.slane %v900_v56, %v2602_v37 }
 0x11d   :  { %1079 = vmatpush1.bf16.msra.mxu1 %v2052_v59 }
 0x11e   :  { %1080 = vmatprep.subr.bf16.mxu1 %v2057_v60 }
 0x121   :  { %1081 = vmatpush1.bf16.msra.mxu1 %v2055_v61 }
 0x122   :  { %1082 = vmatprep.subr.bf16.mxu1 %v2060_v62 }
 0x125   :  { %1083 = vmatpush1.bf16.msra.mxu1 %v2058_v63 }
 0x126   :  { %1084 = vmatprep.subr.bf16.mxu1 %v2063_v0 }
 0x129   :  { %1085 = vmatpush1.bf16.msra.mxu1 %v2061_v1 }
 0x12a   :  { %1086 = vmatprep.subr.bf16.mxu1 %v2066_v2 }
 0x12d   :  { %1087 = vmatpush1.bf16.msra.mxu1 %v2064_v3 }
 0x12e   :  { %1088 = vmatprep.subr.bf16.mxu1 %v2069_v4  ;;  %v2107_v4 = vld [vmem:[%s2777_s4 + $0x30] ss:$8 sps:$4 sm:$0xff]  }
 0x131   :  { %1089 = vmatpush2.bf16.msra.mxu1 %v2067_v5 }
 0x132   :  { %1090 = vmatprep.subr.bf16.mxu1 %v2072_v6  ;;  %v2112_v6 = vld [vmem:[%s2777_s4 + $0x24] ss:$8 sps:$4 sm:$0xff]  }
 0x135   :  { %1091 = vmatpush2.bf16.msra.mxu1 %v2070_v7  ;;  %v2110_v7 = vld [vmem:[%s2777_s4 + $0x20] ss:$8 sps:$4 sm:$0xff]  }
 0x136   :  { %1092 = vmatprep.subr.bf16.mxu1 %v2075_v8  ;;  %v2115_v8 = vld [vmem:[%s2777_s4 + $0x14] ss:$8 sps:$4 sm:$0xff]  }
 0x139   :  { %1093 = vmatpush2.bf16.msra.mxu1 %v2073_v9  ;;  %v2113_v9 = vld [vmem:[%s2777_s4 + $0x10] ss:$8 sps:$4 sm:$0xff]  }
 0x13a   :  { %1094 = vmatprep.subr.bf16.mxu1 %v2078_v10  ;;  %v2118_v10 = vld [vmem:[%s2777_s4 + $0x4] ss:$8 sps:$4 sm:$0xff]  }
 0x13d   :  { %1095 = vmatpush2.bf16.msra.mxu1 %v2076_v11  ;;  %v2121_v11 = vld [vmem:[%s2778_s5 + $0x74] ss:$8 sps:$4 sm:$0xff]  }
 0x13e   :  { %1096 = vmatprep.subr.bf16.mxu1 %v2081_v12  ;;  %v2119_v12 = vld [vmem:[%s2778_s5 + $0x70] ss:$8 sps:$4 sm:$0xff]  }
 0x141   :  { %1097 = vmatpush2.bf16.msra.mxu1 %v2079_v13  ;;  %v2124_v13 = vld [vmem:[%s2778_s5 + $0x64] ss:$8 sps:$4 sm:$0xff]  }
 0x142   :  { %1098 = vmatprep.subr.bf16.mxu1 %v2084_v14  ;;  %v2122_v14 = vld [vmem:[%s2778_s5 + $0x60] ss:$8 sps:$4 sm:$0xff]  }
 0x145   :  { %1099 = vmatpush2.bf16.msra.mxu1 %v2082_v15  ;;  %v2127_v15 = vld [vmem:[%s2778_s5 + $0x54] ss:$8 sps:$4 sm:$0xff]  }
 0x146   :  { %1100 = vmatprep.subr.bf16.mxu1 %v2087_v16  ;;  %v2125_v16 = vld [vmem:[%s2778_s5 + $0x50] ss:$8 sps:$4 sm:$0xff]  }
 0x149   :  { %1101 = vmatpush2.bf16.msra.mxu1 %v2085_v17  ;;  %v2128_v17 = vld [vmem:[%s2778_s5 + $0x40] ss:$8 sps:$4 sm:$0xff]  }
 0x14a   :  { %1102 = vmatprep.subr.bf16.mxu1 %v2090_v18  ;;  %v2133_v18 = vld [vmem:[%s2778_s5 + $0x34] ss:$8 sps:$4 sm:$0xff]  }
 0x14d   :  { %1103 = vmatpush2.bf16.msra.mxu1 %v2088_v19  ;;  %v2131_v19 = vld [vmem:[%s2778_s5 + $0x30] ss:$8 sps:$4 sm:$0xff]  }
 0x14e   :  { %1944 = vmatprep.subr.bf16.mxu1 %v2091_v20  ;;  %v2136_v20 = vld [vmem:[%s2778_s5 + $0x24] ss:$8 sps:$4 sm:$0xff]  }
 0x1d0   :  { %v857_v40 = vpop.f32.mrf.mxu1 }
 0x1d1   :  { %v858_v41 = vadd.f32 %v857_v40, %v772_v38  ;;  %v2157_v38 = vld [vmem:[%s2778_s5 + $0xb4] ss:$8 sps:$4 sm:$0xff]   ;;  %v2158_v40 = vld [vmem:[%s2778_s5 + $0xa0] ss:$8 sps:$4 sm:$0xff]  }
 0x1d2   :  { %v859_v42 = vpop.f32.mrf.mxu1 }
 0x1d3   :  { %v860_v43 = vadd.f32 %v859_v42, %v776_v39  ;;  %v864_v44 = vmax.f32 %v858_v41, 0.0  ;;  %v2160_v39 = vld [vmem:[%s2778_s5 + $0xa4] ss:$8 sps:$4 sm:$0xff]   ;;  %v2163_v41 = vld [vmem:[%s2778_s5 + $0x94] ss:$8 sps:$4 sm:$0xff]  }
 0x1d4   :  { %v861_v45 = vpop.f32.mrf.mxu1  ;;  %v2161_v42 = vld [vmem:[%s2778_s5 + $0x90] ss:$8 sps:$4 sm:$0xff]  }
 0x1d5   :  { %v865_v46 = vmax.f32 %v860_v43, 0.0  ;;  %v866_v49 = vpack.c.bf16 %v864_v44, %v864_v44  ;;  %v2166_v43 = vld [vmem:[%s2778_s5 + $0x84] ss:$8 sps:$4 sm:$0xff]   ;;  %v2164_v44 = vld [vmem:[%s2778_s5 + $0x80] ss:$8 sps:$4 sm:$0xff]  }
 0x1d6   :  { %v862_v47 = vpop.f32.mrf.mxu1 }
 0x1d7   :  { %v867_v48 = vpack.c.bf16 %v865_v46, %v865_v46  ;;  %v1775_v46 = vld [vmem:[%s2774_s7 + $0x5] ss:$0 sm:$0xff] }
 0x1d9   :  { %1104 = vmatprep.mubr.bf16.mxu1 %v867_v48 }
 0x1da   :  { %1105 = vmatmul.mubr.bf16.vlgmr.msra.gmra.mxu1 %v866_v49 }
 0x1db   :  { %1945 = vmatpush3.bf16.msra.mxu1 %v2092_v21  ;;  %v2134_v21 = vld [vmem:[%s2778_s5 + $0x20] ss:$8 sps:$4 sm:$0xff]  }
 0x1dc   :  { %1946 = vmatprep.subr.bf16.mxu1 %v2093_v22  ;;  %v2139_v22 = vld [vmem:[%s2778_s5 + $0x14] ss:$8 sps:$4 sm:$0xff]  }
 0x1df   :  { %1947 = vmatpush3.bf16.msra.mxu1 %v2094_v23  ;;  %v2137_v23 = vld [vmem:[%s2778_s5 + $0x10] ss:$8 sps:$4 sm:$0xff]  }
 0x1e0   :  { %1948 = vmatprep.subr.bf16.mxu1 %v2095_v25  ;;  %v2142_v25 = vld [vmem:[%s2778_s5 + $0x4] ss:$8 sps:$4 sm:$0xff]  }
 0x1e3   :  { %1949 = vmatpush3.bf16.msra.mxu1 %v2096_v26  ;;  %v2140_v26 = vld [vmem:[%s2778_s5] ss:$8 sps:$4 sm:$0xff]  }
 0x1e4   :  { %1950 = vmatprep.subr.bf16.mxu1 %v2097_v27  ;;  %v2145_v27 = vld [vmem:[%s2778_s5 + $0xf4] ss:$8 sps:$4 sm:$0xff]  }
 0x1e7   :  { %1951 = vmatpush3.bf16.msra.mxu1 %v2098_v28  ;;  %v2143_v28 = vld [vmem:[%s2778_s5 + $0xf0] ss:$8 sps:$4 sm:$0xff]  }
 0x1e8   :  { %1952 = vmatprep.subr.bf16.mxu1 %v2099_v29  ;;  %v2148_v29 = vld [vmem:[%s2778_s5 + $0xe4] ss:$8 sps:$4 sm:$0xff]  }
 0x1eb   :  { %1953 = vmatpush3.bf16.msra.mxu1 %v2100_v30  ;;  %v2146_v30 = vld [vmem:[%s2778_s5 + $0xe0] ss:$8 sps:$4 sm:$0xff]  }
 0x1ec   :  { %1954 = vmatprep.subr.bf16.mxu1 %v2101_v31  ;;  %v2149_v31 = vld [vmem:[%s2778_s5 + $0xd0] ss:$8 sps:$4 sm:$0xff]  }
 0x1ef   :  { %1955 = vmatpush3.bf16.msra.mxu1 %v2102_v32  ;;  %v2151_v32 = vld [vmem:[%s2778_s5 + $0xd4] ss:$8 sps:$4 sm:$0xff]  }
 0x1f0   :  { %1956 = vmatprep.subr.bf16.mxu1 %v2103_v50 }
 0x1f3   :  { %1957 = vmatpush3.bf16.msra.mxu1 %v2104_v51 }
 0x1f4   :  { %1958 = vmatprep.subr.bf16.mxu1 %v2105_v52  ;;  %v1268_v52 = vld [vmem:[%s2774_s7 + $0x7] sm:$0x3] }
 0x1f5   :  { %v1277_v55 = vrot.slane %v1268_v52, %v2602_v37 }
 0x1f7   :  { %1959 = vmatpush3.bf16.msra.mxu1 %v2106_v54  ;;  %v1273_v54 = vrot.slane %v1268_v52, %v2597_v35 }
 0x29a   :  { %v1106_v59 = vpop.f32.mrf.mxu1 }
 0x29b   :  { %v1107_v60 = vadd.f32 %v1106_v59, %v905_v57 }
 0x29c   :  { %v1108_v61 = vpop.f32.mrf.mxu1 }
 0x29d   :  { %v1109_v62 = vadd.f32 %v1108_v61, %v909_v58  ;;  %v1113_v63 = vmax.f32 %v1107_v60, 0.0 }
 0x29e   :  { %v1110_v0 = vpop.f32.mrf.mxu1 }
 0x29f   :  { %v1114_v1 = vmax.f32 %v1109_v62, 0.0  ;;  %v1115_v5 = vpack.c.bf16 %v1113_v63, %v1113_v63 }
 0x2a0   :  { %v1111_v2 = vpop.f32.mrf.mxu1 }
 0x2a1   :  { %v1116_v3 = vpack.c.bf16 %v1114_v1, %v1114_v1  ;;  %v1397_v2 = vld [vmem:[%s2774_s7 + $0x9] sm:$0x3] }
 0x2a3   :  { %1252 = vmatprep.mubr.bf16.mxu0 %v1116_v3  ;;  %v1402_v3 = vrot.slane %v1397_v2, %v2597_v35 }
 0x2a4   :  { %1253 = vmatmul.mubr.bf16.vlgmr.msra.gmra.mxu0 %v1115_v5 }
 0x2a5   :  { %1329 = vmatpush1.bf16.msra.mxu0 %v2107_v4  ;;  %1352 = vmatprep.mubr.bf16.mxu0 %v2167_v24  ;;  %v2116_v24 = vld [vmem:[%s2777_s4] ss:$8 sps:$4 sm:$0xff]   ;;  %v1406_v4 = vrot.slane %v1397_v2, %v2602_v37 }
 0x2a6   :  { %1330 = vmatprep.subr.bf16.mxu0 %v2112_v6 }
 0x2a9   :  { %1331 = vmatpush1.bf16.msra.mxu0 %v2110_v7 }
 0x2aa   :  { %1332 = vmatprep.subr.bf16.mxu0 %v2115_v8 }
 0x2ad   :  { %1333 = vmatpush1.bf16.msra.mxu0 %v2113_v9 }
 0x2ae   :  { %1334 = vmatprep.subr.bf16.mxu0 %v2118_v10 }
 0x2b1   :  { %1335 = vmatpush1.bf16.msra.mxu0 %v2116_v24 }
 0x2b2   :  { %1569 = vmatprep.subr.bf16.mxu0 %v2121_v11 }
 0x2b4   :  { %1800 = vmatmul.mubr.msk.bf16.vlgmr.msra.gmra.mxu0 %vm819_vm0, %v2463_v53  ;;  %v2130_v53 = vld [vmem:[%s2778_s5 + $0x44] ss:$8 sps:$4 sm:$0xff]  }
 0x2b5   :  { %1570 = vmatpush1.bf16.msra.mxu0 %v2119_v12 }
 0x2b6   :  { %1571 = vmatprep.subr.bf16.mxu0 %v2124_v13 }
 0x2b9   :  { %1572 = vmatpush1.bf16.msra.mxu0 %v2122_v14 }
 0x2ba   :  { %1573 = vmatprep.subr.bf16.mxu0 %v2127_v15  ;;  %v1833_v15 = vld [vmem:[%s2774_s7 + $0x6] ss:$0 sm:$0xff] }
 0x2bd   :  { %1574 = vmatpush1.bf16.msra.mxu0 %v2125_v16 }
 0x2be   :  { %1575 = vmatprep.subr.bf16.mxu0 %v2130_v53 }
 0x2c1   :  { %1576 = vmatpush1.bf16.msra.mxu0 %v2128_v17 }
 0x2c2   :  { %1577 = vmatprep.subr.bf16.mxu0 %v2133_v18 }
 0x2c5   :  { %1578 = vmatpush1.bf16.msra.mxu0 %v2131_v19 }
 0x2c6   :  { %1579 = vmatprep.subr.bf16.mxu0 %v2136_v20 }
 0x2c9   :  { %1580 = vmatpush1.bf16.msra.mxu0 %v2134_v21 }
 0x2ca   :  { %1581 = vmatprep.subr.bf16.mxu0 %v2139_v22 }
 0x2cd   :  { %1582 = vmatpush1.bf16.msra.mxu0 %v2137_v23 }
 0x2ce   :  { %1583 = vmatprep.subr.bf16.mxu0 %v2142_v25 }
 0x2d1   :  { %1584 = vmatpush1.bf16.msra.mxu0 %v2140_v26 }
 0x2d2   :  { %1585 = vmatprep.subr.bf16.mxu0 %v2145_v27 }
 0x2d5   :  { %1586 = vmatpush2.bf16.msra.mxu0 %v2143_v28 }
 0x2d6   :  { %1587 = vmatprep.subr.bf16.mxu0 %v2148_v29 }
 0x2d9   :  { %1588 = vmatpush2.bf16.msra.mxu0 %v2146_v30 }
 0x2da   :  { %1589 = vmatprep.subr.bf16.mxu0 %v2151_v32 }
 0x2dd   :  { %1590 = vmatpush2.bf16.msra.mxu0 %v2149_v31 }
 0x2de   :  { %1591 = vmatprep.subr.bf16.mxu0 %v2154_v33 }
 0x2e1   :  { %1592 = vmatpush2.bf16.msra.mxu0 %v2152_v34 }
 0x2e2   :  { %1593 = vmatprep.subr.bf16.mxu0 %v2157_v38 }
 0x2e5   :  { %1594 = vmatpush2.bf16.msra.mxu0 %v2155_v36 }
 0x2e6   :  { %1595 = vmatprep.subr.bf16.mxu0 %v2160_v39 }
 0x2e9   :  { %1596 = vmatpush2.bf16.msra.mxu0 %v2158_v40 }
 0x2ea   :  { %1597 = vmatprep.subr.bf16.mxu0 %v2163_v41 }
 0x2ed   :  { %1598 = vmatpush2.bf16.msra.mxu0 %v2161_v42 }
 0x2ee   :  { %1599 = vmatprep.subr.bf16.mxu0 %v2166_v43 }
 0x2f1   :  { %1600 = vmatpush2.bf16.msra.mxu0 %v2164_v44 }
 0x364   :  { %v1938_v45 = vpop.f32.mrf.mxu0 }
 0x366   :  { %v1939_v47 = vpop.f32.mrf.mxu0 }
 0x367   :  { %v1940_v48 = vadd.f32 %v1939_v47, %v1938_v45 }
 0x368   :  { %v1941_v49 = vpop.f32.mrf.mxu0 }
 0x369   :  { %v1255_v50 = vadd.f32 %v1940_v48, %v1775_v46 }
 0x36a   :  { %v1942_v51 = vpop.f32.mrf.mxu0 }
 0x36b   :  { %1663 = vst.msk [vmem:[%s2775_s8 + $0x8] sm:$0xff] %vm1662_vm1, %v1255_v50 }
 0x374   :  { %v1354_v56 = vpop.f32.mrf.mxu0 }
 0x375   :  { %v1355_v57 = vadd.f32 %v1354_v56, %v1273_v54 }
 0x376   :  { %v1356_v58 = vpop.f32.mrf.mxu0 }
 0x377   :  { %v1357_v59 = vadd.f32 %v1356_v58, %v1277_v55  ;;  %v1361_v60 = vmax.f32 %v1355_v57, 0.0 }
 0x378   :  { %v1358_v61 = vpop.f32.mrf.mxu0 }
 0x379   :  { %v1362_v62 = vmax.f32 %v1357_v59, 0.0  ;;  %v1363_v1 = vpack.c.bf16 %v1361_v60, %v1361_v60 }
 0x37a   :  { %v1359_v63 = vpop.f32.mrf.mxu0 }
 0x37b   :  { %v1364_v0 = vpack.c.bf16 %v1362_v62, %v1362_v62 }
 0x37d   :  { %1601 = vmatprep.mubr.bf16.mxu0 %v1364_v0 }
 0x37e   :  { %1602 = vmatmul.mubr.bf16.vlgmr.msra.gmra.mxu0 %v1363_v1 }
 0x43e   :  { %v1603_v5 = vpop.f32.mrf.mxu0 }
 0x43f   :  { %v1604_v6 = vadd.f32 %v1603_v5, %v1402_v3 }
 0x440   :  { %v1605_v7 = vpop.f32.mrf.mxu0 }
 0x441   :  { %v1606_v8 = vadd.f32 %v1605_v7, %v1406_v4  ;;  %v1610_v9 = vmax.f32 %v1604_v6, 0.0 }
 0x442   :  { %v1607_v10 = vpop.f32.mrf.mxu0 }
 0x443   :  { %v1611_v24 = vmax.f32 %v1606_v8, 0.0  ;;  %v1612_v13 = vpack.c.bf16 %v1610_v9, %v1610_v9 }
 0x444   :  { %v1608_v11 = vpop.f32.mrf.mxu0 }
 0x445   :  { %v1613_v12 = vpack.c.bf16 %v1611_v24, %v1611_v24 }
 0x447   :  { %1653 = vmatprep.mubr.bf16.mxu1 %v1613_v12 }
 0x448   :  { %1654 = vmatmul.mubr.bf16.vlgmr.msra.gmra.mxu1 %v1612_v13 }
 0x508   :  { %v1960_v14 = vpop.f32.mrf.mxu1 }
 0x50a   :  { %v1961_v35 = vpop.f32.mrf.mxu1 }
 0x50b   :  { %v1962_v16 = vadd.f32 %v1961_v35, %v1960_v14 }
 0x50c   :  { %v1963_v37 = vpop.f32.mrf.mxu1 }
 0x50d   :  { %v1656_v53 = vadd.f32 %v1962_v16, %v1833_v15 }
 0x50e   :  { %v1964_v17 = vpop.f32.mrf.mxu1 }
 0x50f   :  { %1664 = vst.msk [vmem:[%s2775_s8 + $0x10] sm:$0xff] %vm1662_vm1, %v1656_v53 }

</bundles_post_ra>
